<compile_context>
chip_gen: v6e
topology: v6e:2x2x1
jax: 0.10.0
libtpu: 0.0.40
codegen_flags: <defaults>
</compile_context>

<pallas_src>
import functools

import jax
import jax.numpy as jnp
from jax.experimental import pallas as pl
from jax.experimental.pallas import tpu as pltpu


# ---------------------------------------------------------------- kernel ----

def _conv3x3(x, w_ref, masks, W, HW):
    """3x3 'same' conv with reflection padding on a flattened (Cin, HW) plane.

    x:     (Cin, HW) float32 activations (lane-dense).
    w_ref: (9, Cout, Cin) bf16 weights, k = di*3 + dj (cross-correlation taps).
    Returns (Cout, HW) float32.
    """
    m_col0, m_colL, m_row0, m_rowL = masks

    # Column (dx) shifts: lane rolls by +-1 with reflect fixup at j=0 / j=W-1.
    left = pltpu.roll(x, HW - 1, axis=1)    # left[p]  = x[p + 1]
    right = pltpu.roll(x, 1, axis=1)        # right[p] = x[p - 1]
    cols = (
        jnp.where(m_col0, left, right),     # dx = -1 : reflect j=0   -> j=1
        x,                                  # dx =  0
        jnp.where(m_colL, right, left),     # dx = +1 : reflect j=W-1 -> j=W-2
    )

    Cout = w_ref.shape[1]
    acc = jnp.zeros((Cout, HW), jnp.float32)
    for dj in range(3):
        xc = cols[dj]
        # Row (dy) shifts: lane rolls by +-W with reflect fixup at i=0 / i=H-1.
        up = pltpu.roll(xc, W, axis=1)          # up[p]   = xc[p - W]
        down = pltpu.roll(xc, HW - W, axis=1)   # down[p] = xc[p + W]
        rows = (
            jnp.where(m_row0, down, up),        # dy = -1 : reflect i=0   -> 1
            xc,                                 # dy =  0
            jnp.where(m_rowL, up, down),        # dy = +1 : reflect i=H-1 -> H-2
        )
        for di in range(3):
            tap = rows[di].astype(jnp.bfloat16)
            acc = acc + jnp.dot(w_ref[di * 3 + dj], tap,
                                preferred_element_type=jnp.float32)
    return acc


def _in_stats(y, inv_hw, eps=1e-5):
    """Fused single-pass InstanceNorm statistics (per-channel, biased var)."""
    s1 = jnp.sum(y, axis=1, keepdims=True)
    s2 = jnp.sum(y * y, axis=1, keepdims=True)
    mean = s1 * inv_hw
    var = jnp.maximum(s2 * inv_hw - mean * mean, 0.0)
    return mean, jax.lax.rsqrt(var + eps)


def residual_block_kernel(x_ref, idx_ref, w1_ref, w2_ref, o_ref, *, H, W):
    x = x_ref[0]                              # (C, HW) float32
    HW = H * W
    inv_hw = 1.0 / HW

    idx = idx_ref[...]                        # (2, HW) int32, [col; row]
    col = idx[0:1, :]
    row = idx[1:2, :]
    masks = (col == 0, col == W - 1, row == 0, row == H - 1)

    # conv1 -> InstanceNorm (+ReLU fused into the normalize write)
    y = _conv3x3(x, w1_ref, masks, W, HW)
    mean1, inv1 = _in_stats(y, inv_hw)
    h = jnp.maximum((y - mean1) * inv1, 0.0)

    # conv2 -> InstanceNorm (+residual add fused into the normalize write)
    z = _conv3x3(h, w2_ref, masks, W, HW)
    mean2, inv2 = _in_stats(z, inv_hw)
    o_ref[0] = (x + (z - mean2) * inv2).astype(o_ref.dtype)


# --------------------------------------------------------------- wrapper ----

def residual_block(x, w1, b1, w2, b2):
    """x: (N, C, H, W) f32; w*: (C, C, 3, 3) f32 (PyTorch OIHW); b*: (C,) f32.

    The conv biases are accepted for API compatibility but not used: a
    per-channel bias is exactly cancelled by the following InstanceNorm's
    per-channel mean subtraction (no affine), so it is dead work.
    """
    del b1, b2  # exactly cancelled by InstanceNorm mean subtraction
    N, C, H, W = x.shape
    HW = H * W

    # Repack weights to (9, Cout, Cin), k = kh*3 + kw, and cast to bf16 for the
    # MXU (f32 accumulation inside the kernel).
    w1r = jnp.transpose(w1, (2, 3, 0, 1)).reshape(9, C, C).astype(jnp.bfloat16)
    w2r = jnp.transpose(w2, (2, 3, 0, 1)).reshape(9, C, C).astype(jnp.bfloat16)

    # Lane-dense activations: (N, C, H*W).
    x2 = x.reshape(N, C, HW)

    # Precomputed flat column/row indices for the reflect-boundary masks
    # (avoids in-kernel integer div/mod).
    pos = jnp.arange(HW, dtype=jnp.int32)
    idx = jnp.stack([pos % W, pos // W], axis=0)          # (2, HW)

    # Explicit VMEM budget: in/out blocks (double-buffered) + weights + an
    # allowance for the f32/bf16 intermediates (taps, accumulator, y/h/z).
    blk = C * HW * 4
    est = (4 * blk                      # x + out blocks, double-buffered
           + 4 * 9 * C * C * 2          # two bf16 weight blocks, double-buffered
           + 4 * HW * 4                 # index block
           + 14 * blk)                  # in-flight intermediates
    vmem_limit = int(min(max(est, 16 * 2**20), 64 * 2**20))

    out = pl.pallas_call(
        functools.partial(residual_block_kernel, H=H, W=W),
        out_shape=jax.ShapeDtypeStruct((N, C, HW), x.dtype),
        grid_spec=pltpu.PrefetchScalarGridSpec(
            num_scalar_prefetch=0,
            grid=(N,),
            in_specs=[
                pl.BlockSpec((1, C, HW), lambda n: (n, 0, 0)),   # x
                pl.BlockSpec((2, HW),    lambda n: (0, 0)),      # col/row idx
                pl.BlockSpec((9, C, C),  lambda n: (0, 0, 0)),   # w1 (bf16)
                pl.BlockSpec((9, C, C),  lambda n: (0, 0, 0)),   # w2 (bf16)
            ],
            out_specs=pl.BlockSpec((1, C, HW), lambda n: (n, 0, 0)),
        ),
        compiler_params=pltpu.CompilerParams(
            dimension_semantics=("parallel",),
            vmem_limit_bytes=vmem_limit),
    )(x2, idx, w1r, w2r)

    return out.reshape(N, C, H, W)


# ------------------------------------------------------- pure-JAX reference -

def residual_block_ref(x, w1, b1, w2, b2):
    def conv(h, w, b):
        hp = jnp.pad(h, ((0, 0), (0, 0), (1, 1), (1, 1)), mode="reflect")
        y = jax.lax.conv_general_dilated(
            hp, w, (1, 1), "VALID",
            dimension_numbers=("NCHW", "OIHW", "NCHW"),
            precision=jax.lax.Precision.HIGHEST)
        return y + b[None, :, None, None]

    def inorm(y, eps=1e-5):
        mean = y.mean(axis=(2, 3), keepdims=True)
        var = ((y - mean) ** 2).mean(axis=(2, 3), keepdims=True)
        return (y - mean) * jax.lax.rsqrt(var + eps)

    h = jax.nn.relu(inorm(conv(x, w1, b1)))
    return x + inorm(conv(h, w2, b2))


# ------------------------------------------------------------------ main ----

if __name__ == "__main__":
    N, C, H, W = 2, 4, 16, 16  # features = C
    key = jax.random.PRNGKey(0)
    kx, kw1, kb1, kw2, kb2 = jax.random.split(key, 5)

    x = jax.random.normal(kx, (N, C, H, W), jnp.float32)
    w1 = 0.1 * jax.random.normal(kw1, (C, C, 3, 3), jnp.float32)
    b1 = 0.1 * jax.random.normal(kb1, (C,), jnp.float32)
    w2 = 0.1 * jax.random.normal(kw2, (C, C, 3, 3), jnp.float32)
    b2 = 0.1 * jax.random.normal(kb2, (C,), jnp.float32)

    out = jax.block_until_ready(residual_block(x, w1, b1, w2, b2))
    ref = residual_block_ref(x, w1, b1, w2, b2)

    assert out.shape == (N, C, H, W)
    # Kernel uses bf16 MXU inputs (f32 accumulation); reference is f32 HIGHEST,
    # so the tolerance is loosened accordingly.
    max_err = float(jnp.max(jnp.abs(out - ref)))
    assert jnp.allclose(out, ref, atol=6e-2, rtol=6e-2), max_err

    print("KERNEL_OK")
</pallas_src>

<mosaic_0001>
module attributes {stable_mosaic.version = 11 : i64} {
  func.func @residual_block_kernel(%arg0: i32, %arg1: memref<1x4x256xf32, #tpu.memory_space<vmem>>, %arg2: memref<2x256xi32, #tpu.memory_space<vmem>>, %arg3: memref<9x4x4xbf16, #tpu.memory_space<vmem>>, %arg4: memref<9x4x4xbf16, #tpu.memory_space<vmem>>, %arg5: memref<1x4x256xf32, #tpu.memory_space<vmem>>) attributes {dimension_semantics = [#tpu.dimension_semantics<parallel>], iteration_bounds = array<i64: 2>, scalar_prefetch = 0 : i64, scratch_operands = 0 : i64, tpu.core_type = #tpu.core_type<tc>, window_params = [{transform_indices = @transform_0, window_bounds = array<i64: 1, 4, 256>}, {pipeline_mode = #tpu.pipeline_mode<synchronous>, transform_indices = @transform_1, window_bounds = array<i64: 2, 256>}, {pipeline_mode = #tpu.pipeline_mode<synchronous>, transform_indices = @transform_2, window_bounds = array<i64: 9, 4, 4>}, {pipeline_mode = #tpu.pipeline_mode<synchronous>, transform_indices = @transform_3, window_bounds = array<i64: 9, 4, 4>}, {transform_indices = @transform_4, window_bounds = array<i64: 1, 4, 256>}]} {
    %c0 = arith.constant 0 : index
    %c0_0 = arith.constant 0 : index
    %c0_1 = arith.constant 0 : index
    %0 = vector.load %arg1[%c0, %c0_0, %c0_1] : memref<1x4x256xf32, #tpu.memory_space<vmem>>, vector<1x4x256xf32>
    %1 = vector.shape_cast %0 : vector<1x4x256xf32> to vector<4x256xf32>
    %c0_2 = arith.constant 0 : index
    %c0_3 = arith.constant 0 : index
    %2 = vector.load %arg2[%c0_2, %c0_3] : memref<2x256xi32, #tpu.memory_space<vmem>>, vector<2x256xi32>
    %3 = vector.extract_strided_slice %2 {offsets = [0, 0], sizes = [1, 256], strides = [1, 1]} : vector<2x256xi32> to vector<1x256xi32>
    %4 = vector.extract_strided_slice %2 {offsets = [1, 0], sizes = [1, 256], strides = [1, 1]} : vector<2x256xi32> to vector<1x256xi32>
    %c0_i32 = arith.constant 0 : i32
    %5 = vector.broadcast %c0_i32 : i32 to vector<1x256xi32>
    %6 = arith.cmpi eq, %3, %5 : vector<1x256xi32>
    %c15_i32 = arith.constant 15 : i32
    %7 = vector.broadcast %c15_i32 : i32 to vector<1x256xi32>
    %8 = arith.cmpi eq, %3, %7 : vector<1x256xi32>
    %c0_i32_4 = arith.constant 0 : i32
    %9 = vector.broadcast %c0_i32_4 : i32 to vector<1x256xi32>
    %10 = arith.cmpi eq, %4, %9 : vector<1x256xi32>
    %c15_i32_5 = arith.constant 15 : i32
    %11 = vector.broadcast %c15_i32_5 : i32 to vector<1x256xi32>
    %12 = arith.cmpi eq, %4, %11 : vector<1x256xi32>
    %c255_i32 = arith.constant 255 : i32
    %13 = tpu.dynamic_rotate %1 by %c255_i32 dim 1 : vector<4x256xf32>, i32 -> vector<4x256xf32>
    %c1_i32 = arith.constant 1 : i32
    %14 = tpu.dynamic_rotate %1 by %c1_i32 dim 1 : vector<4x256xf32>, i32 -> vector<4x256xf32>
    %15 = vector.shape_cast %6 : vector<1x256xi1> to vector<1x256xi1>
    %16 = vector.broadcast %15 : vector<1x256xi1> to vector<4x256xi1>
    %17 = arith.select %16, %13, %14 : vector<4x256xi1>, vector<4x256xf32>
    %18 = vector.shape_cast %8 : vector<1x256xi1> to vector<1x256xi1>
    %19 = vector.broadcast %18 : vector<1x256xi1> to vector<4x256xi1>
    %20 = arith.select %19, %14, %13 : vector<4x256xi1>, vector<4x256xf32>
    %cst = arith.constant 0.000000e+00 : f32
    %21 = vector.broadcast %cst : f32 to vector<4x256xf32>
    %c16_i32 = arith.constant 16 : i32
    %22 = tpu.dynamic_rotate %17 by %c16_i32 dim 1 : vector<4x256xf32>, i32 -> vector<4x256xf32>
    %c240_i32 = arith.constant 240 : i32
    %23 = tpu.dynamic_rotate %17 by %c240_i32 dim 1 : vector<4x256xf32>, i32 -> vector<4x256xf32>
    %24 = vector.shape_cast %10 : vector<1x256xi1> to vector<1x256xi1>
    %25 = vector.broadcast %24 : vector<1x256xi1> to vector<4x256xi1>
    %26 = arith.select %25, %23, %22 : vector<4x256xi1>, vector<4x256xf32>
    %27 = vector.shape_cast %12 : vector<1x256xi1> to vector<1x256xi1>
    %28 = vector.broadcast %27 : vector<1x256xi1> to vector<4x256xi1>
    %29 = arith.select %28, %22, %23 : vector<4x256xi1>, vector<4x256xf32>
    %30 = arith.truncf %26 : vector<4x256xf32> to vector<4x256xbf16>
    %c0_6 = arith.constant 0 : index
    %c0_7 = arith.constant 0 : index
    %c0_8 = arith.constant 0 : index
    %31 = vector.load %arg3[%c0_6, %c0_7, %c0_8] : memref<9x4x4xbf16, #tpu.memory_space<vmem>>, vector<1x4x4xbf16>
    %32 = vector.shape_cast %31 : vector<1x4x4xbf16> to vector<4x4xbf16>
    %cst_9 = arith.constant dense<0.000000e+00> : vector<4x256xf32>
    %33 = tpu.matmul %32, %30, %cst_9 {dimension_numbers = #tpu.dot_dimension_numbers<[1], [0], [0], [1], [0, 0, 1, 1], [], []>} : vector<4x4xbf16>, vector<4x256xbf16>, vector<4x256xf32> -> vector<4x256xf32>
    %34 = arith.addf %21, %33 : vector<4x256xf32>
    %35 = arith.truncf %17 : vector<4x256xf32> to vector<4x256xbf16>
    %c3 = arith.constant 3 : index
    %c0_10 = arith.constant 0 : index
    %c0_11 = arith.constant 0 : index
    %36 = vector.load %arg3[%c3, %c0_10, %c0_11] : memref<9x4x4xbf16, #tpu.memory_space<vmem>>, vector<1x4x4xbf16>
    %37 = vector.shape_cast %36 : vector<1x4x4xbf16> to vector<4x4xbf16>
    %cst_12 = arith.constant dense<0.000000e+00> : vector<4x256xf32>
    %38 = tpu.matmul %37, %35, %cst_12 {dimension_numbers = #tpu.dot_dimension_numbers<[1], [0], [0], [1], [0, 0, 1, 1], [], []>} : vector<4x4xbf16>, vector<4x256xbf16>, vector<4x256xf32> -> vector<4x256xf32>
    %39 = arith.addf %34, %38 : vector<4x256xf32>
    %40 = arith.truncf %29 : vector<4x256xf32> to vector<4x256xbf16>
    %c6 = arith.constant 6 : index
    %c0_13 = arith.constant 0 : index
    %c0_14 = arith.constant 0 : index
    %41 = vector.load %arg3[%c6, %c0_13, %c0_14] : memref<9x4x4xbf16, #tpu.memory_space<vmem>>, vector<1x4x4xbf16>
    %42 = vector.shape_cast %41 : vector<1x4x4xbf16> to vector<4x4xbf16>
    %cst_15 = arith.constant dense<0.000000e+00> : vector<4x256xf32>
    %43 = tpu.matmul %42, %40, %cst_15 {dimension_numbers = #tpu.dot_dimension_numbers<[1], [0], [0], [1], [0, 0, 1, 1], [], []>} : vector<4x4xbf16>, vector<4x256xbf16>, vector<4x256xf32> -> vector<4x256xf32>
    %44 = arith.addf %39, %43 : vector<4x256xf32>
    %c16_i32_16 = arith.constant 16 : i32
    %45 = tpu.dynamic_rotate %1 by %c16_i32_16 dim 1 : vector<4x256xf32>, i32 -> vector<4x256xf32>
    %c240_i32_17 = arith.constant 240 : i32
    %46 = tpu.dynamic_rotate %1 by %c240_i32_17 dim 1 : vector<4x256xf32>, i32 -> vector<4x256xf32>
    %47 = vector.shape_cast %10 : vector<1x256xi1> to vector<1x256xi1>
    %48 = vector.broadcast %47 : vector<1x256xi1> to vector<4x256xi1>
    %49 = arith.select %48, %46, %45 : vector<4x256xi1>, vector<4x256xf32>
    %50 = vector.shape_cast %12 : vector<1x256xi1> to vector<1x256xi1>
    %51 = vector.broadcast %50 : vector<1x256xi1> to vector<4x256xi1>
    %52 = arith.select %51, %45, %46 : vector<4x256xi1>, vector<4x256xf32>
    %53 = arith.truncf %49 : vector<4x256xf32> to vector<4x256xbf16>
    %c1 = arith.constant 1 : index
    %c0_18 = arith.constant 0 : index
    %c0_19 = arith.constant 0 : index
    %54 = vector.load %arg3[%c1, %c0_18, %c0_19] : memref<9x4x4xbf16, #tpu.memory_space<vmem>>, vector<1x4x4xbf16>
    %55 = vector.shape_cast %54 : vector<1x4x4xbf16> to vector<4x4xbf16>
    %cst_20 = arith.constant dense<0.000000e+00> : vector<4x256xf32>
    %56 = tpu.matmul %55, %53, %cst_20 {dimension_numbers = #tpu.dot_dimension_numbers<[1], [0], [0], [1], [0, 0, 1, 1], [], []>} : vector<4x4xbf16>, vector<4x256xbf16>, vector<4x256xf32> -> vector<4x256xf32>
    %57 = arith.addf %44, %56 : vector<4x256xf32>
    %58 = arith.truncf %1 : vector<4x256xf32> to vector<4x256xbf16>
    %c4 = arith.constant 4 : index
    %c0_21 = arith.constant 0 : index
    %c0_22 = arith.constant 0 : index
    %59 = vector.load %arg3[%c4, %c0_21, %c0_22] : memref<9x4x4xbf16, #tpu.memory_space<vmem>>, vector<1x4x4xbf16>
    %60 = vector.shape_cast %59 : vector<1x4x4xbf16> to vector<4x4xbf16>
    %cst_23 = arith.constant dense<0.000000e+00> : vector<4x256xf32>
    %61 = tpu.matmul %60, %58, %cst_23 {dimension_numbers = #tpu.dot_dimension_numbers<[1], [0], [0], [1], [0, 0, 1, 1], [], []>} : vector<4x4xbf16>, vector<4x256xbf16>, vector<4x256xf32> -> vector<4x256xf32>
    %62 = arith.addf %57, %61 : vector<4x256xf32>
    %63 = arith.truncf %52 : vector<4x256xf32> to vector<4x256xbf16>
    %c7 = arith.constant 7 : index
    %c0_24 = arith.constant 0 : index
    %c0_25 = arith.constant 0 : index
    %64 = vector.load %arg3[%c7, %c0_24, %c0_25] : memref<9x4x4xbf16, #tpu.memory_space<vmem>>, vector<1x4x4xbf16>
    %65 = vector.shape_cast %64 : vector<1x4x4xbf16> to vector<4x4xbf16>
    %cst_26 = arith.constant dense<0.000000e+00> : vector<4x256xf32>
    %66 = tpu.matmul %65, %63, %cst_26 {dimension_numbers = #tpu.dot_dimension_numbers<[1], [0], [0], [1], [0, 0, 1, 1], [], []>} : vector<4x4xbf16>, vector<4x256xbf16>, vector<4x256xf32> -> vector<4x256xf32>
    %67 = arith.addf %62, %66 : vector<4x256xf32>
    %c16_i32_27 = arith.constant 16 : i32
    %68 = tpu.dynamic_rotate %20 by %c16_i32_27 dim 1 : vector<4x256xf32>, i32 -> vector<4x256xf32>
    %c240_i32_28 = arith.constant 240 : i32
    %69 = tpu.dynamic_rotate %20 by %c240_i32_28 dim 1 : vector<4x256xf32>, i32 -> vector<4x256xf32>
    %70 = vector.shape_cast %10 : vector<1x256xi1> to vector<1x256xi1>
    %71 = vector.broadcast %70 : vector<1x256xi1> to vector<4x256xi1>
    %72 = arith.select %71, %69, %68 : vector<4x256xi1>, vector<4x256xf32>
    %73 = vector.shape_cast %12 : vector<1x256xi1> to vector<1x256xi1>
    %74 = vector.broadcast %73 : vector<1x256xi1> to vector<4x256xi1>
    %75 = arith.select %74, %68, %69 : vector<4x256xi1>, vector<4x256xf32>
    %76 = arith.truncf %72 : vector<4x256xf32> to vector<4x256xbf16>
    %c2 = arith.constant 2 : index
    %c0_29 = arith.constant 0 : index
    %c0_30 = arith.constant 0 : index
    %77 = vector.load %arg3[%c2, %c0_29, %c0_30] : memref<9x4x4xbf16, #tpu.memory_space<vmem>>, vector<1x4x4xbf16>
    %78 = vector.shape_cast %77 : vector<1x4x4xbf16> to vector<4x4xbf16>
    %cst_31 = arith.constant dense<0.000000e+00> : vector<4x256xf32>
    %79 = tpu.matmul %78, %76, %cst_31 {dimension_numbers = #tpu.dot_dimension_numbers<[1], [0], [0], [1], [0, 0, 1, 1], [], []>} : vector<4x4xbf16>, vector<4x256xbf16>, vector<4x256xf32> -> vector<4x256xf32>
    %80 = arith.addf %67, %79 : vector<4x256xf32>
    %81 = arith.truncf %20 : vector<4x256xf32> to vector<4x256xbf16>
    %c5 = arith.constant 5 : index
    %c0_32 = arith.constant 0 : index
    %c0_33 = arith.constant 0 : index
    %82 = vector.load %arg3[%c5, %c0_32, %c0_33] : memref<9x4x4xbf16, #tpu.memory_space<vmem>>, vector<1x4x4xbf16>
    %83 = vector.shape_cast %82 : vector<1x4x4xbf16> to vector<4x4xbf16>
    %cst_34 = arith.constant dense<0.000000e+00> : vector<4x256xf32>
    %84 = tpu.matmul %83, %81, %cst_34 {dimension_numbers = #tpu.dot_dimension_numbers<[1], [0], [0], [1], [0, 0, 1, 1], [], []>} : vector<4x4xbf16>, vector<4x256xbf16>, vector<4x256xf32> -> vector<4x256xf32>
    %85 = arith.addf %80, %84 : vector<4x256xf32>
    %86 = arith.truncf %75 : vector<4x256xf32> to vector<4x256xbf16>
    %c8 = arith.constant 8 : index
    %c0_35 = arith.constant 0 : index
    %c0_36 = arith.constant 0 : index
    %87 = vector.load %arg3[%c8, %c0_35, %c0_36] : memref<9x4x4xbf16, #tpu.memory_space<vmem>>, vector<1x4x4xbf16>
    %88 = vector.shape_cast %87 : vector<1x4x4xbf16> to vector<4x4xbf16>
    %cst_37 = arith.constant dense<0.000000e+00> : vector<4x256xf32>
    %89 = tpu.matmul %88, %86, %cst_37 {dimension_numbers = #tpu.dot_dimension_numbers<[1], [0], [0], [1], [0, 0, 1, 1], [], []>} : vector<4x4xbf16>, vector<4x256xbf16>, vector<4x256xf32> -> vector<4x256xf32>
    %90 = arith.addf %85, %89 : vector<4x256xf32>
    %cst_38 = arith.constant dense<0.000000e+00> : vector<4xf32>
    %91 = vector.multi_reduction <add>, %90, %cst_38 [1] : vector<4x256xf32> to vector<4xf32>
    %92 = vector.shape_cast %91 : vector<4xf32> to vector<4x1xf32>
    %93 = arith.mulf %90, %90 : vector<4x256xf32>
    %cst_39 = arith.constant dense<0.000000e+00> : vector<4xf32>
    %94 = vector.multi_reduction <add>, %93, %cst_39 [1] : vector<4x256xf32> to vector<4xf32>
    %95 = vector.shape_cast %94 : vector<4xf32> to vector<4x1xf32>
    %cst_40 = arith.constant 3.906250e-03 : f32
    %96 = vector.broadcast %cst_40 : f32 to vector<4x1xf32>
    %97 = arith.mulf %92, %96 : vector<4x1xf32>
    %cst_41 = arith.constant 3.906250e-03 : f32
    %98 = vector.broadcast %cst_41 : f32 to vector<4x1xf32>
    %99 = arith.mulf %95, %98 : vector<4x1xf32>
    %100 = arith.mulf %97, %97 : vector<4x1xf32>
    %101 = arith.subf %99, %100 : vector<4x1xf32>
    %cst_42 = arith.constant 0.000000e+00 : f32
    %102 = vector.broadcast %cst_42 : f32 to vector<4x1xf32>
    %103 = arith.maximumf %101, %102 : vector<4x1xf32>
    %cst_43 = arith.constant 9.99999974E-6 : f32
    %104 = vector.broadcast %cst_43 : f32 to vector<4x1xf32>
    %105 = arith.addf %103, %104 : vector<4x1xf32>
    %106 = math.rsqrt %105 : vector<4x1xf32>
    %107 = vector.broadcast %97 : vector<4x1xf32> to vector<4x256xf32>
    %108 = arith.subf %90, %107 : vector<4x256xf32>
    %109 = vector.broadcast %106 : vector<4x1xf32> to vector<4x256xf32>
    %110 = arith.mulf %108, %109 : vector<4x256xf32>
    %cst_44 = arith.constant 0.000000e+00 : f32
    %111 = vector.broadcast %cst_44 : f32 to vector<4x256xf32>
    %112 = arith.maximumf %110, %111 : vector<4x256xf32>
    %c255_i32_45 = arith.constant 255 : i32
    %113 = tpu.dynamic_rotate %112 by %c255_i32_45 dim 1 : vector<4x256xf32>, i32 -> vector<4x256xf32>
    %c1_i32_46 = arith.constant 1 : i32
    %114 = tpu.dynamic_rotate %112 by %c1_i32_46 dim 1 : vector<4x256xf32>, i32 -> vector<4x256xf32>
    %115 = vector.shape_cast %6 : vector<1x256xi1> to vector<1x256xi1>
    %116 = vector.broadcast %115 : vector<1x256xi1> to vector<4x256xi1>
    %117 = arith.select %116, %113, %114 : vector<4x256xi1>, vector<4x256xf32>
    %118 = vector.shape_cast %8 : vector<1x256xi1> to vector<1x256xi1>
    %119 = vector.broadcast %118 : vector<1x256xi1> to vector<4x256xi1>
    %120 = arith.select %119, %114, %113 : vector<4x256xi1>, vector<4x256xf32>
    %cst_47 = arith.constant 0.000000e+00 : f32
    %121 = vector.broadcast %cst_47 : f32 to vector<4x256xf32>
    %c16_i32_48 = arith.constant 16 : i32
    %122 = tpu.dynamic_rotate %117 by %c16_i32_48 dim 1 : vector<4x256xf32>, i32 -> vector<4x256xf32>
    %c240_i32_49 = arith.constant 240 : i32
    %123 = tpu.dynamic_rotate %117 by %c240_i32_49 dim 1 : vector<4x256xf32>, i32 -> vector<4x256xf32>
    %124 = vector.shape_cast %10 : vector<1x256xi1> to vector<1x256xi1>
    %125 = vector.broadcast %124 : vector<1x256xi1> to vector<4x256xi1>
    %126 = arith.select %125, %123, %122 : vector<4x256xi1>, vector<4x256xf32>
    %127 = vector.shape_cast %12 : vector<1x256xi1> to vector<1x256xi1>
    %128 = vector.broadcast %127 : vector<1x256xi1> to vector<4x256xi1>
    %129 = arith.select %128, %122, %123 : vector<4x256xi1>, vector<4x256xf32>
    %130 = arith.truncf %126 : vector<4x256xf32> to vector<4x256xbf16>
    %c0_50 = arith.constant 0 : index
    %c0_51 = arith.constant 0 : index
    %c0_52 = arith.constant 0 : index
    %131 = vector.load %arg4[%c0_50, %c0_51, %c0_52] : memref<9x4x4xbf16, #tpu.memory_space<vmem>>, vector<1x4x4xbf16>
    %132 = vector.shape_cast %131 : vector<1x4x4xbf16> to vector<4x4xbf16>
    %cst_53 = arith.constant dense<0.000000e+00> : vector<4x256xf32>
    %133 = tpu.matmul %132, %130, %cst_53 {dimension_numbers = #tpu.dot_dimension_numbers<[1], [0], [0], [1], [0, 0, 1, 1], [], []>} : vector<4x4xbf16>, vector<4x256xbf16>, vector<4x256xf32> -> vector<4x256xf32>
    %134 = arith.addf %121, %133 : vector<4x256xf32>
    %135 = arith.truncf %117 : vector<4x256xf32> to vector<4x256xbf16>
    %c3_54 = arith.constant 3 : index
    %c0_55 = arith.constant 0 : index
    %c0_56 = arith.constant 0 : index
    %136 = vector.load %arg4[%c3_54, %c0_55, %c0_56] : memref<9x4x4xbf16, #tpu.memory_space<vmem>>, vector<1x4x4xbf16>
    %137 = vector.shape_cast %136 : vector<1x4x4xbf16> to vector<4x4xbf16>
    %cst_57 = arith.constant dense<0.000000e+00> : vector<4x256xf32>
    %138 = tpu.matmul %137, %135, %cst_57 {dimension_numbers = #tpu.dot_dimension_numbers<[1], [0], [0], [1], [0, 0, 1, 1], [], []>} : vector<4x4xbf16>, vector<4x256xbf16>, vector<4x256xf32> -> vector<4x256xf32>
    %139 = arith.addf %134, %138 : vector<4x256xf32>
    %140 = arith.truncf %129 : vector<4x256xf32> to vector<4x256xbf16>
    %c6_58 = arith.constant 6 : index
    %c0_59 = arith.constant 0 : index
    %c0_60 = arith.constant 0 : index
    %141 = vector.load %arg4[%c6_58, %c0_59, %c0_60] : memref<9x4x4xbf16, #tpu.memory_space<vmem>>, vector<1x4x4xbf16>
    %142 = vector.shape_cast %141 : vector<1x4x4xbf16> to vector<4x4xbf16>
    %cst_61 = arith.constant dense<0.000000e+00> : vector<4x256xf32>
    %143 = tpu.matmul %142, %140, %cst_61 {dimension_numbers = #tpu.dot_dimension_numbers<[1], [0], [0], [1], [0, 0, 1, 1], [], []>} : vector<4x4xbf16>, vector<4x256xbf16>, vector<4x256xf32> -> vector<4x256xf32>
    %144 = arith.addf %139, %143 : vector<4x256xf32>
    %c16_i32_62 = arith.constant 16 : i32
    %145 = tpu.dynamic_rotate %112 by %c16_i32_62 dim 1 : vector<4x256xf32>, i32 -> vector<4x256xf32>
    %c240_i32_63 = arith.constant 240 : i32
    %146 = tpu.dynamic_rotate %112 by %c240_i32_63 dim 1 : vector<4x256xf32>, i32 -> vector<4x256xf32>
    %147 = vector.shape_cast %10 : vector<1x256xi1> to vector<1x256xi1>
    %148 = vector.broadcast %147 : vector<1x256xi1> to vector<4x256xi1>
    %149 = arith.select %148, %146, %145 : vector<4x256xi1>, vector<4x256xf32>
    %150 = vector.shape_cast %12 : vector<1x256xi1> to vector<1x256xi1>
    %151 = vector.broadcast %150 : vector<1x256xi1> to vector<4x256xi1>
    %152 = arith.select %151, %145, %146 : vector<4x256xi1>, vector<4x256xf32>
    %153 = arith.truncf %149 : vector<4x256xf32> to vector<4x256xbf16>
    %c1_64 = arith.constant 1 : index
    %c0_65 = arith.constant 0 : index
    %c0_66 = arith.constant 0 : index
    %154 = vector.load %arg4[%c1_64, %c0_65, %c0_66] : memref<9x4x4xbf16, #tpu.memory_space<vmem>>, vector<1x4x4xbf16>
    %155 = vector.shape_cast %154 : vector<1x4x4xbf16> to vector<4x4xbf16>
    %cst_67 = arith.constant dense<0.000000e+00> : vector<4x256xf32>
    %156 = tpu.matmul %155, %153, %cst_67 {dimension_numbers = #tpu.dot_dimension_numbers<[1], [0], [0], [1], [0, 0, 1, 1], [], []>} : vector<4x4xbf16>, vector<4x256xbf16>, vector<4x256xf32> -> vector<4x256xf32>
    %157 = arith.addf %144, %156 : vector<4x256xf32>
    %158 = arith.truncf %112 : vector<4x256xf32> to vector<4x256xbf16>
    %c4_68 = arith.constant 4 : index
    %c0_69 = arith.constant 0 : index
    %c0_70 = arith.constant 0 : index
    %159 = vector.load %arg4[%c4_68, %c0_69, %c0_70] : memref<9x4x4xbf16, #tpu.memory_space<vmem>>, vector<1x4x4xbf16>
    %160 = vector.shape_cast %159 : vector<1x4x4xbf16> to vector<4x4xbf16>
    %cst_71 = arith.constant dense<0.000000e+00> : vector<4x256xf32>
    %161 = tpu.matmul %160, %158, %cst_71 {dimension_numbers = #tpu.dot_dimension_numbers<[1], [0], [0], [1], [0, 0, 1, 1], [], []>} : vector<4x4xbf16>, vector<4x256xbf16>, vector<4x256xf32> -> vector<4x256xf32>
    %162 = arith.addf %157, %161 : vector<4x256xf32>
    %163 = arith.truncf %152 : vector<4x256xf32> to vector<4x256xbf16>
    %c7_72 = arith.constant 7 : index
    %c0_73 = arith.constant 0 : index
    %c0_74 = arith.constant 0 : index
    %164 = vector.load %arg4[%c7_72, %c0_73, %c0_74] : memref<9x4x4xbf16, #tpu.memory_space<vmem>>, vector<1x4x4xbf16>
    %165 = vector.shape_cast %164 : vector<1x4x4xbf16> to vector<4x4xbf16>
    %cst_75 = arith.constant dense<0.000000e+00> : vector<4x256xf32>
    %166 = tpu.matmul %165, %163, %cst_75 {dimension_numbers = #tpu.dot_dimension_numbers<[1], [0], [0], [1], [0, 0, 1, 1], [], []>} : vector<4x4xbf16>, vector<4x256xbf16>, vector<4x256xf32> -> vector<4x256xf32>
    %167 = arith.addf %162, %166 : vector<4x256xf32>
    %c16_i32_76 = arith.constant 16 : i32
    %168 = tpu.dynamic_rotate %120 by %c16_i32_76 dim 1 : vector<4x256xf32>, i32 -> vector<4x256xf32>
    %c240_i32_77 = arith.constant 240 : i32
    %169 = tpu.dynamic_rotate %120 by %c240_i32_77 dim 1 : vector<4x256xf32>, i32 -> vector<4x256xf32>
    %170 = vector.shape_cast %10 : vector<1x256xi1> to vector<1x256xi1>
    %171 = vector.broadcast %170 : vector<1x256xi1> to vector<4x256xi1>
    %172 = arith.select %171, %169, %168 : vector<4x256xi1>, vector<4x256xf32>
    %173 = vector.shape_cast %12 : vector<1x256xi1> to vector<1x256xi1>
    %174 = vector.broadcast %173 : vector<1x256xi1> to vector<4x256xi1>
    %175 = arith.select %174, %168, %169 : vector<4x256xi1>, vector<4x256xf32>
    %176 = arith.truncf %172 : vector<4x256xf32> to vector<4x256xbf16>
    %c2_78 = arith.constant 2 : index
    %c0_79 = arith.constant 0 : index
    %c0_80 = arith.constant 0 : index
    %177 = vector.load %arg4[%c2_78, %c0_79, %c0_80] : memref<9x4x4xbf16, #tpu.memory_space<vmem>>, vector<1x4x4xbf16>
    %178 = vector.shape_cast %177 : vector<1x4x4xbf16> to vector<4x4xbf16>
    %cst_81 = arith.constant dense<0.000000e+00> : vector<4x256xf32>
    %179 = tpu.matmul %178, %176, %cst_81 {dimension_numbers = #tpu.dot_dimension_numbers<[1], [0], [0], [1], [0, 0, 1, 1], [], []>} : vector<4x4xbf16>, vector<4x256xbf16>, vector<4x256xf32> -> vector<4x256xf32>
    %180 = arith.addf %167, %179 : vector<4x256xf32>
    %181 = arith.truncf %120 : vector<4x256xf32> to vector<4x256xbf16>
    %c5_82 = arith.constant 5 : index
    %c0_83 = arith.constant 0 : index
    %c0_84 = arith.constant 0 : index
    %182 = vector.load %arg4[%c5_82, %c0_83, %c0_84] : memref<9x4x4xbf16, #tpu.memory_space<vmem>>, vector<1x4x4xbf16>
    %183 = vector.shape_cast %182 : vector<1x4x4xbf16> to vector<4x4xbf16>
    %cst_85 = arith.constant dense<0.000000e+00> : vector<4x256xf32>
    %184 = tpu.matmul %183, %181, %cst_85 {dimension_numbers = #tpu.dot_dimension_numbers<[1], [0], [0], [1], [0, 0, 1, 1], [], []>} : vector<4x4xbf16>, vector<4x256xbf16>, vector<4x256xf32> -> vector<4x256xf32>
    %185 = arith.addf %180, %184 : vector<4x256xf32>
    %186 = arith.truncf %175 : vector<4x256xf32> to vector<4x256xbf16>
    %c8_86 = arith.constant 8 : index
    %c0_87 = arith.constant 0 : index
    %c0_88 = arith.constant 0 : index
    %187 = vector.load %arg4[%c8_86, %c0_87, %c0_88] : memref<9x4x4xbf16, #tpu.memory_space<vmem>>, vector<1x4x4xbf16>
    %188 = vector.shape_cast %187 : vector<1x4x4xbf16> to vector<4x4xbf16>
    %cst_89 = arith.constant dense<0.000000e+00> : vector<4x256xf32>
    %189 = tpu.matmul %188, %186, %cst_89 {dimension_numbers = #tpu.dot_dimension_numbers<[1], [0], [0], [1], [0, 0, 1, 1], [], []>} : vector<4x4xbf16>, vector<4x256xbf16>, vector<4x256xf32> -> vector<4x256xf32>
    %190 = arith.addf %185, %189 : vector<4x256xf32>
    %cst_90 = arith.constant dense<0.000000e+00> : vector<4xf32>
    %191 = vector.multi_reduction <add>, %190, %cst_90 [1] : vector<4x256xf32> to vector<4xf32>
    %192 = vector.shape_cast %191 : vector<4xf32> to vector<4x1xf32>
    %193 = arith.mulf %190, %190 : vector<4x256xf32>
    %cst_91 = arith.constant dense<0.000000e+00> : vector<4xf32>
    %194 = vector.multi_reduction <add>, %193, %cst_91 [1] : vector<4x256xf32> to vector<4xf32>
    %195 = vector.shape_cast %194 : vector<4xf32> to vector<4x1xf32>
    %cst_92 = arith.constant 3.906250e-03 : f32
    %196 = vector.broadcast %cst_92 : f32 to vector<4x1xf32>
    %197 = arith.mulf %192, %196 : vector<4x1xf32>
    %cst_93 = arith.constant 3.906250e-03 : f32
    %198 = vector.broadcast %cst_93 : f32 to vector<4x1xf32>
    %199 = arith.mulf %195, %198 : vector<4x1xf32>
    %200 = arith.mulf %197, %197 : vector<4x1xf32>
    %201 = arith.subf %199, %200 : vector<4x1xf32>
    %cst_94 = arith.constant 0.000000e+00 : f32
    %202 = vector.broadcast %cst_94 : f32 to vector<4x1xf32>
    %203 = arith.maximumf %201, %202 : vector<4x1xf32>
    %cst_95 = arith.constant 9.99999974E-6 : f32
    %204 = vector.broadcast %cst_95 : f32 to vector<4x1xf32>
    %205 = arith.addf %203, %204 : vector<4x1xf32>
    %206 = math.rsqrt %205 : vector<4x1xf32>
    %207 = vector.broadcast %197 : vector<4x1xf32> to vector<4x256xf32>
    %208 = arith.subf %190, %207 : vector<4x256xf32>
    %209 = vector.broadcast %206 : vector<4x1xf32> to vector<4x256xf32>
    %210 = arith.mulf %208, %209 : vector<4x256xf32>
    %211 = arith.addf %1, %210 : vector<4x256xf32>
    %c0_96 = arith.constant 0 : index
    %c0_97 = arith.constant 0 : index
    %c0_98 = arith.constant 0 : index
    %212 = vector.load %arg5[%c0_96, %c0_97, %c0_98] : memref<1x4x256xf32, #tpu.memory_space<vmem>>, vector<1x4x256xf32>
    %213 = vector.shape_cast %212 : vector<1x4x256xf32> to vector<4x256xf32>
    %214 = vector.shape_cast %211 : vector<4x256xf32> to vector<1x4x256xf32>
    tpu.vector_store %arg5[%c0_96, %c0_97, %c0_98], %214 {strides = array<i32>} : memref<1x4x256xf32, #tpu.memory_space<vmem>>, vector<1x4x256xf32>,
    return
  }
  func.func @transform_0(%arg0: i32) -> (i32, i32, i32) {
    %c0_i32 = arith.constant 0 : i32
    %c0_i32_0 = arith.constant 0 : i32
    %c0_i32_1 = arith.constant 0 : i32
    return %arg0, %c0_i32, %c0_i32_0 : i32, i32, i32
  }
  func.func @transform_1(%arg0: i32) -> (i32, i32) {
    %c0_i32 = arith.constant 0 : i32
    %c0_i32_0 = arith.constant 0 : i32
    %c0_i32_1 = arith.constant 0 : i32
    return %c0_i32, %c0_i32_0 : i32, i32
  }
  func.func @transform_2(%arg0: i32) -> (i32, i32, i32) {
    %c0_i32 = arith.constant 0 : i32
    %c0_i32_0 = arith.constant 0 : i32
    %c0_i32_1 = arith.constant 0 : i32
    %c0_i32_2 = arith.constant 0 : i32
    return %c0_i32, %c0_i32_0, %c0_i32_1 : i32, i32, i32
  }
  func.func @transform_3(%arg0: i32) -> (i32, i32, i32) {
    %c0_i32 = arith.constant 0 : i32
    %c0_i32_0 = arith.constant 0 : i32
    %c0_i32_1 = arith.constant 0 : i32
    %c0_i32_2 = arith.constant 0 : i32
    return %c0_i32, %c0_i32_0, %c0_i32_1 : i32, i32, i32
  }
  func.func @transform_4(%arg0: i32) -> (i32, i32, i32) {
    %c0_i32 = arith.constant 0 : i32
    %c0_i32_0 = arith.constant 0 : i32
    %c0_i32_1 = arith.constant 0 : i32
    return %arg0, %c0_i32, %c0_i32_0 : i32, i32, i32
  }
}

</mosaic_0001>

<bundles_post_ra>
// kernel: tpu_custom_call.1
= control target key start
LH: loop header
LB: loop body
LE: loop exit
PB: predicated region body
PF: predicated region fallthrough
CT: control target
= control target key end

     0   :  { %9 = vsyncpa [#allocation3], 0  ;;  %s2276_s0 = inlined_call_operand.vmem [shape: f32[2,4,256], index: 0, kind: input, shape index: {}]   ;;  %s2277_s1 = inlined_call_operand.vmem [shape: s32[2,256], index: 1, kind: input, shape index: {}]   ;;  %s2278_s2 = inlined_call_operand.vmem [shape: bf16[9,4,4], index: 2, kind: input, shape index: {}]   ;;  %s2279_s3 = inlined_call_operand.vmem [shape: bf16[9,4,4], index: 3, kind: input, shape index: {}]   ;;  %s2280_s4 = inlined_call_operand.hbm [shape: f32[2,4,256], index: 4, kind: output, shape index: {}]  }
   0x1   :  { %11 = vsyncpa [#allocation3 + $0x1], 0  ;;  %s1829_s15 = smov 0   ;;  %s1831_s16 = smov 0  }
   0x2   :  { %s1833_s17 = smov 0   ;;  %s1835_s18 = smov 0  }
   0x3 LB: > { %s1850_s19 = sadd.s32 4294967295, %s1796_s18   ;;  %s1541_s20 = sadd.s32 4294967294, %s1796_s18   ;;  %s1796_s18 = sphi %s1835_s18, %s2294_s18   ;;  %s1792_s17 = sphi %s1833_s17, %s2293_s17   ;;  %s1788_s16 = sphi %s1831_s16, %s2292_s16   ;;  %s1784_s15 = sphi %s1829_s15, %s2291_s15  }
   0x4   : > { %s1854_s21 = sadd.s32 1, %s1796_s18   ;;  %s113_s22 = sadd.s32 1, %s1792_s17 }
   0x5   : > { %s110_s23 = ssub.s32 %s1796_s18, %s1854_s21  ;;  %p123_p0 = scmp.ne.s32.totalorder %s1792_s17, %s1788_s16 }
   0x6   : > { %p111_p1 = scmp.eq.s32.totalorder %s110_s23, 0  ;;  %p124_p2 = scmp.eq.s32.totalorder %s1850_s19, 1 }
   0x7   : > { %p129_p3 = scmp.ne.s32.totalorder %s1788_s16, %s1784_s15  ;;  %p130_p4 = scmp.eq.s32.totalorder %s1541_s20, 1 }
   0x8   : > { %s1865_s24 = scalar_select %p111_p1, %s1792_s17, %s113_s22  }
   0x9   : > { %p1867_p5 = por %p124_p2, %p123_p0  ;;  %p1871_p6 = por %p130_p4, %p129_p3 }
   0xa   : > { %p1544_p7 = scmp.ge.s32.totalorder %s1796_s18, 1  ;;  %p165_p8 = scmp.lt.s32.totalorder %s1796_s18, 3 }
   0xc   : > { %p166_p9 = pnand %p1544_p7, %p165_p8 }
   0xd   : > { %p191_p10 = scmp.lt.s32.totalorder (!%p166_p9), %s1850_s19, 1  ;;  %s1799_s6 = smov (!%p166_p9), 127  }
   0xe   : > { %169 = sbr.rel (%p166_p9) target bundleno = 1334 (0x536), region = 36  ;;  %s1800_s7 = smov (!%p166_p9), 1  }
   0xf   : > { %s1801_s8 = smov (!%p166_p9), 16   ;;  %s1802_s13 = smov (!%p166_p9), 112  }
  0x10   : > { %s1803_s10 = smov (!%p166_p9), [#allocation2]  }
  0x11   : > { %s1740_s11 = sshll.u32 (!%p166_p9), %s1803_s10, 4  ;;  %s1741_s11 = int_to_ptr.vmem [resolvable:$false] %s1740_s11 }
  0x13   : > { %v1798_v0 = vmov 0   ;;  %s192_s27 = scalar_select %p191_p10, %s1850_s19, 1  ;;  %v208_v4 = vlaneseq  ;;  %v198_v5 = vld [vmem:[%s2277_s1] sm:$0xf]  ;;  %vm327_vm8 = vcmask 1041408   ;;  %vm323_vm9 = vcmask 31744  }
  0x14   : > { %366 = vmatprep.mubr.bf16.mxu0 %v1798_v0  ;;  %416 = vmatprep.mubr.bf16.mxu1 %v1798_v0  ;;  %vm199_vm0 = vcmp.eq.s32.totalorder %v198_v5, 0  ;;  %vm200_vm1 = vcmp.eq.s32.totalorder %v198_v5, 15  ;;  %v1548_v41 = vld [vmem:[%s2278_s2 + $0x6] sm:$0x3] }
  0x15   : > { %s1605_s28 = sshll.u32 %s192_s27, 3  ;;  %v222_v6 = vshrl.u32 %v208_v4, 7  ;;  %v220_v9 = vsel %vm199_vm0, 1, %v1798_v0  ;;  %v241_v10 = vsel %vm200_vm1, 1, %v1798_v0  ;;  %v1900_v15 = vand.u32 127, %v208_v4 }
  0x16   : > { %s195_s5 = scalar_lea.vmem %s2276_s0, %s1605_s28  ;;  %vm849_vm0 = vcmask 1043456   ;;  %v1574_v24 = vld [vmem:[%s2279_s3 + $0x6] sm:$0x3] }
  0x17   : > { %v1884_v1 = vld [vmem:[%s195_s5] sm:$0xff]  ;;  %v223_v7 = vsub.s32 0, %v222_v6  ;;  %v227_v8 = vsub.s32 2, %v222_v6  ;;  %vm210_vm2 = vcmp.lt.s32.totalorder %v1900_v15, 127  ;;  %vm217_vm3 = vcmp.lt.s32.totalorder %v1900_v15, 1 }
  0x18   : > { %v1888_v2 = vcombine.high %v1884_v1, %v1884_v1  ;;  %v282_v42 = vsub.s32 3, %v222_v6  ;;  %v278_v43 = vsub.s32 1, %v222_v6  ;;  %vm266_vm10 = vcmp.lt.s32.totalorder %v1900_v15, 16 }
  0x19   : > { %v228_v11 = vrot.slane %v220_v9, %v227_v8  ;;  %v245_v12 = vrot.slane %v241_v10, %v223_v7  ;;  %v249_v13 = vrot.slane %v241_v10, %v227_v8  ;;  %v224_v14 = vrot.slane %v220_v9, %v223_v7 }
  0x1a   : > { %v1651_v3 = vpack.i.bf16 %v1888_v2, %v1884_v1  ;;  %v283_v44 = vrot.slane %v220_v9, %v282_v42  ;;  %v303_v45 = vrot.slane %v241_v10, %v282_v42  ;;  %v279_v46 = vrot.slane %v220_v9, %v278_v43 }
  0x1b   : > { %v236_v17 = vrot.slane %v228_v11, %v223_v7  ;;  %v1902_v18 = vrot.slane %v245_v12, %v223_v7  ;;  %v257_v19 = vrot.slane %v249_v13, %v223_v7  ;;  %v1904_v20 = vrot.slane %v224_v14, %v223_v7 }
  0x1c   : > { %1652 = vrot.lane.b32.xlu0 %v1651_v3, %s1799_s6  ;;  %v299_v47 = vrot.slane %v241_v10, %v278_v43  ;;  %v291_v49 = vrot.slane %v283_v44, %v278_v43  ;;  %v311_v50 = vrot.slane %v303_v45, %v278_v43  ;;  %v1952_v52 = vrot.slane %v279_v46, %v278_v43 }
  0x1d   : > { %vm1908_vm4 = vcmp.eq.s32.totalorder %v236_v17, 1  ;;  %vm258_vm5 = vcmp.eq.s32.totalorder %v1902_v18, 1  ;;  %vm1913_vm6 = vcmp.eq.s32.totalorder %v257_v19, 1  ;;  %vm237_vm7 = vcmp.eq.s32.totalorder %v1904_v20, 1 }
  0x1e   : > { %v1954_v53 = vrot.slane %v299_v47, %v278_v43  ;;  %vm273_vm11 = vcmp.lt.s32.totalorder %v1900_v15, 112  ;;  %vm1958_vm12 = vcmp.eq.s32.totalorder %v291_v49, 1  ;;  %vm1962_vm13 = vcmp.eq.s32.totalorder %v311_v50, 1 }
  0x1f   : > { %vm292_vm14 = vcmp.eq.s32.totalorder %v1952_v52, 1  ;;  %v554_v4 = vpack.c.bf16 %v1888_v2, %v1888_v2  ;;  %v553_v5 = vpack.c.bf16 %v1884_v1, %v1884_v1 }
  0x20   : > { %1657 = vrot.lane.b32.xlu0 %v1651_v3, %s1800_s7  ;;  %vm312_vm15 = vcmp.eq.s32.totalorder %v1954_v53, 1 }
  0x21   : > { %v561_v44 = vsel %vm327_vm8, %v553_v5, 0 }
  0x24   : > { %1672 = vrot.lane.b32.xlu0 %v1651_v3, %s1801_s8 }
  0x8e   : > { %v1653_v16 = vpop.permute.xlu0 %1652 }
  0x8f   : > { %v1655_v21 = vunpack.i.h.bf16 %v1653_v16  ;;  %v1654_v22 = vunpack.i.l.bf16 %v1653_v16 }
  0x91   : > { %v211_v28 = vsel %vm210_vm2, %v1654_v22, %v1655_v21  ;;  %v212_v30 = vsel %vm210_vm2, %v1655_v21, %v1654_v22 }
  0x92   : > { %v1658_v23 = vpop.permute.xlu0 %1657 }
  0x93   : > { %v1660_v25 = vunpack.i.h.bf16 %v1658_v23  ;;  %v1659_v26 = vunpack.i.l.bf16 %v1658_v23 }
  0x95   : > { %v219_v29 = vsel %vm217_vm3, %v1660_v25, %v1659_v26  ;;  %v218_v31 = vsel %vm217_vm3, %v1659_v26, %v1660_v25 }
  0x96   : > { %v240_v32 = vsel %vm1908_vm4, %v212_v30, %v218_v31  ;;  %v1930_v33 = vsel %vm258_vm5, %v219_v29, %v211_v28  ;;  %v1934_v34 = vsel %vm1913_vm6, %v218_v31, %v212_v30  ;;  %v239_v35 = vsel %vm237_vm7, %v211_v28, %v219_v29  ;;  %v1673_v51 = vpop.permute.xlu0 %1672 }
  0x97   : > { %v320_v36 = vpack.c.bf16 %v240_v32, %v240_v32  ;;  %v1681_v37 = vpack.i.bf16 %v1934_v34, %v1930_v33  ;;  %v1661_v38 = vpack.i.bf16 %v240_v32, %v239_v35  ;;  %v319_v39 = vpack.c.bf16 %v239_v35, %v239_v35 }
  0x98   : > { %v1675_v54 = vunpack.i.h.bf16 %v1673_v51  ;;  %v1674_v55 = vunpack.i.l.bf16 %v1673_v51  ;;  %v738_v5 = vpack.c.bf16 %v1934_v34, %v1934_v34  ;;  %v1562_v34 = vld [vmem:[%s2278_s2 + $0xe] sm:$0x3] }
  0x99   : > { %1549 = vmatprep.subr.msk.bf16.mxu0 %vm327_vm8, %v320_v36  ;;  %1682 = vrot.lane.b32.xlu0 %v1681_v37, %s1801_s8  ;;  %v329_v40 = vsel %vm327_vm8, %v319_v39, 0  ;;  %v318_v39 = vld [vmem:[%s2278_s2] sm:$0x3] }
  0x9a   : > { %1662 = vrot.lane.b32.xlu1 %v1661_v38, %s1801_s8  ;;  %349 = vmatpush1.bf16.msra.mxu0 %v329_v40  ;;  %v485_v63 = vsel %vm266_vm10, %v1674_v55, %v1675_v54  ;;  %v1553_v40 = vld [vmem:[%s2278_s2 + $0xc] sm:$0x3] }
  0x9d   : > { %1550 = vmatmul.mubr.msk.bf16.vlgmr.msra.gmra.mxu0 %vm323_vm9, %v1548_v41 }
  0x9e   : > { %1667 = vrot.lane.b32.xlu1 %v1661_v38, %s1802_s13  ;;  %470 = vmatprep.mubr.bf16.mxu0 %v1798_v0 }
  0xa2   : > { %1677 = vrot.lane.b32.xlu1 %v1651_v3, %s1802_s13  ;;  %v486_v3 = vsel %vm266_vm10, %v1675_v54, %v1674_v55 }
  0xa6   : > { %1687 = vrot.lane.b32.xlu1 %v1681_v37, %s1802_s13 }
 0x10b   : > { %v1683_v6 = vpop.permute.xlu0 %1682 }
 0x10c   : > { %v1663_v48 = vpop.permute.xlu1 %1662  ;;  %v1685_v22 = vunpack.i.h.bf16 %v1683_v6  ;;  %v1684_v23 = vunpack.i.l.bf16 %v1683_v6 }
 0x10d   : > { %v1665_v56 = vunpack.i.h.bf16 %v1663_v48  ;;  %v1664_v57 = vunpack.i.l.bf16 %v1663_v48 }
 0x10e   : > { %v669_v43 = vsel %vm266_vm10, %v1684_v23, %v1685_v22  ;;  %v670_v50 = vsel %vm266_vm10, %v1685_v22, %v1684_v23 }
 0x10f   : > { %v267_v7 = vsel %vm266_vm10, %v1664_v57, %v1665_v56  ;;  %v268_v9 = vsel %vm266_vm10, %v1665_v56, %v1664_v57 }
 0x110   : > { %v1668_v58 = vpop.permute.xlu1 %1667 }
 0x111   : > { %v1670_v61 = vunpack.i.h.bf16 %v1668_v58  ;;  %v1669_v62 = vunpack.i.l.bf16 %v1668_v58 }
 0x113   : > { %v275_v8 = vsel %vm273_vm11, %v1670_v61, %v1669_v62  ;;  %v274_v10 = vsel %vm273_vm11, %v1669_v62, %v1670_v61  ;;  %v1556_v61 = vld [vmem:[%s2278_s2 + $0x2] sm:$0x3]  ;;  %v1559_v62 = vld [vmem:[%s2278_s2 + $0x8] sm:$0x3] }
 0x114   : > { %v1678_v11 = vpop.permute.xlu1 %1677  ;;  %v295_v2 = vsel %vm1958_vm12, %v275_v8, %v267_v7  ;;  %v315_v12 = vsel %vm1962_vm13, %v267_v7, %v275_v8  ;;  %v294_v13 = vsel %vm292_vm14, %v274_v10, %v268_v9  ;;  %v314_v14 = vsel %vm312_vm15, %v268_v9, %v274_v10  ;;  %v1565_v10 = vld [vmem:[%s2278_s2 + $0x4] sm:$0x3] }
 0x115   : > { %v1680_v16 = vunpack.i.h.bf16 %v1678_v11  ;;  %v1679_v17 = vunpack.i.l.bf16 %v1678_v11  ;;  %v317_v19 = vpack.c.bf16 %v295_v2, %v295_v2  ;;  %v426_v21 = vpack.c.bf16 %v315_v12, %v315_v12  ;;  %v1571_v12 = vld [vmem:[%s2278_s2 + $0x10] sm:$0x3] }
 0x116   : > { %v316_v25 = vpack.c.bf16 %v294_v13, %v294_v13  ;;  %v425_v26 = vpack.c.bf16 %v314_v14, %v314_v14  ;;  %v737_v8 = vpack.c.bf16 %v1930_v33, %v1930_v33  ;;  %v1568_v33 = vld [vmem:[%s2278_s2 + $0xa] sm:$0x3] }
 0x117   : > { %v491_v28 = vsel %vm273_vm11, %v1679_v17, %v1680_v16  ;;  %v492_v29 = vsel %vm273_vm11, %v1680_v16, %v1679_v17  ;;  %1551 = vmatprep.subr.msk.bf16.mxu1 %vm327_vm8, %v317_v19  ;;  %1554 = vmatprep.subr.msk.bf16.mxu0 %vm327_vm8, %v426_v21 }
 0x118   : > { %v1688_v30 = vpop.permute.xlu1 %1687  ;;  %v379_v31 = vsel %vm327_vm8, %v316_v25, 0  ;;  %v433_v32 = vsel %vm327_vm8, %v425_v26, 0  ;;  %v494_v35 = vsel %vm1958_vm12, %v492_v29, %v485_v63  ;;  %v493_v36 = vsel %vm292_vm14, %v491_v28, %v486_v3 }
 0x119   : > { %v1690_v37 = vunpack.i.h.bf16 %v1688_v30  ;;  %v1689_v38 = vunpack.i.l.bf16 %v1688_v30  ;;  %399 = vmatpush1.bf16.msra.mxu1 %v379_v31  ;;  %453 = vmatpush1.bf16.msra.mxu0 %v433_v32  ;;  %v498_v41 = vpack.c.bf16 %v494_v35, %v494_v35  ;;  %v497_v42 = vpack.c.bf16 %v493_v36, %v493_v36 }
 0x11a   : > { %1560 = vmatprep.subr.msk.bf16.mxu0 %vm327_vm8, %v554_v4  ;;  %v496_v45 = vsel %vm1962_vm13, %v485_v63, %v492_v29  ;;  %v495_v55 = vsel %vm312_vm15, %v486_v3, %v491_v28  ;;  %v745_v11 = vsel %vm327_vm8, %v737_v8, 0 }
 0x11b   : > { %v675_v46 = vsel %vm273_vm11, %v1689_v38, %v1690_v37  ;;  %v676_v47 = vsel %vm273_vm11, %v1690_v37, %v1689_v38  ;;  %1557 = vmatprep.subr.msk.bf16.mxu1 %vm327_vm8, %v498_v41  ;;  %v505_v48 = vsel %vm327_vm8, %v497_v42, 0  ;;  %v610_v49 = vpack.c.bf16 %v496_v45, %v496_v45 }
 0x11c   : > { %1552 = vmatmul.mubr.msk.bf16.vlgmr.msra.gmra.mxu1 %vm323_vm9, %v318_v39  ;;  %1555 = vmatmul.mubr.msk.bf16.vlgmr.msra.gmra.mxu0 %vm323_vm9, %v1553_v40  ;;  %v678_v51 = vsel %vm1958_vm12, %v676_v47, %v669_v43  ;;  %v677_v56 = vsel %vm292_vm14, %v675_v46, %v670_v50  ;;  %v609_v57 = vpack.c.bf16 %v495_v55, %v495_v55 }
 0x11d   : > { %525 = vmatpush1.bf16.msra.mxu1 %v505_v48  ;;  %581 = vmatpush1.bf16.msra.mxu0 %v561_v44  ;;  %v682_v54 = vpack.c.bf16 %v678_v51, %v678_v51  ;;  %v681_v58 = vpack.c.bf16 %v677_v56, %v677_v56  ;;  %v680_v63 = vsel %vm1962_vm13, %v669_v43, %v676_v47 }
 0x11e   : > { %1563 = vmatprep.subr.msk.bf16.mxu1 %vm327_vm8, %v610_v49  ;;  %542 = vmatprep.mubr.bf16.mxu1 %v1798_v0  ;;  %v617_v3 = vsel %vm327_vm8, %v609_v57, 0  ;;  %v794_v6 = vpack.c.bf16 %v680_v63, %v680_v63  ;;  %v679_v7 = vsel %vm312_vm15, %v670_v50, %v675_v46 }
 0x11f   : > { %1566 = vmatprep.subr.msk.bf16.mxu0 %vm327_vm8, %v682_v54  ;;  %598 = vmatprep.mubr.bf16.mxu0 %v1798_v0  ;;  %v689_v4 = vsel %vm327_vm8, %v681_v58, 0  ;;  %v793_v9 = vpack.c.bf16 %v679_v7, %v679_v7 }
 0x121   : > { %v801_v2 = vsel %vm327_vm8, %v793_v9, 0 }
 0x124   : > { %1558 = vmatmul.mubr.msk.bf16.vlgmr.msra.gmra.mxu1 %vm323_vm9, %v1556_v61  ;;  %1561 = vmatmul.mubr.msk.bf16.vlgmr.msra.gmra.mxu0 %vm323_vm9, %v1559_v62 }
 0x125   : > { %637 = vmatpush1.bf16.msra.mxu1 %v617_v3  ;;  %709 = vmatpush1.bf16.msra.mxu0 %v689_v4 }
 0x126   : > { %1569 = vmatprep.subr.msk.bf16.mxu1 %vm327_vm8, %v738_v5  ;;  %1572 = vmatprep.subr.msk.bf16.mxu0 %vm327_vm8, %v794_v6 }
 0x127   : > { %654 = vmatprep.mubr.bf16.mxu1 %v1798_v0  ;;  %726 = vmatprep.mubr.bf16.mxu0 %v1798_v0 }
 0x12c   : > { %1564 = vmatmul.mubr.msk.bf16.vlgmr.msra.gmra.mxu1 %vm323_vm9, %v1562_v34  ;;  %1567 = vmatmul.mubr.msk.bf16.vlgmr.msra.gmra.mxu0 %vm323_vm9, %v1565_v10 }
 0x12d   : > { %765 = vmatpush1.bf16.msra.mxu1 %v745_v11  ;;  %821 = vmatpush1.bf16.msra.mxu0 %v801_v2 }
 0x12e   : > { %782 = vmatprep.mubr.bf16.mxu1 %v1798_v0  ;;  %838 = vmatprep.mubr.bf16.mxu0 %v1798_v0 }
 0x134   : > { %1570 = vmatmul.mubr.msk.bf16.vlgmr.msra.gmra.mxu1 %vm323_vm9, %v1568_v33  ;;  %1573 = vmatmul.mubr.msk.bf16.vlgmr.msra.gmra.mxu0 %vm323_vm9, %v1571_v12 }
 0x135   : > { %955 = vmatprep.mubr.bf16.mxu1 %v1798_v0  ;;  %1005 = vmatprep.mubr.bf16.mxu0 %v1798_v0 }
 0x15d   : > { %v368_v13 = vpop.f32.mrf.mxu0 }
 0x15f   : > { %v370_v14 = vpop.f32.mrf.mxu0 }
 0x161   : > { %v372_v16 = vpop.f32.mrf.mxu0 }
 0x163   : > { %v373_v17 = vpop.f32.mrf.mxu0 }
 0x1dc   : > { %v418_v19 = vpop.f32.mrf.mxu1  ;;  %v472_v21 = vpop.f32.mrf.mxu0 }
 0x1dd   : > { %v419_v30 = vadd.f32 %v418_v19, %v368_v13 }
 0x1de   : > { %v420_v22 = vpop.f32.mrf.mxu1  ;;  %v474_v23 = vpop.f32.mrf.mxu0 }
 0x1df   : > { %v421_v35 = vadd.f32 %v420_v22, %v370_v14  ;;  %v479_v38 = vadd.f32 %v472_v21, %v419_v30 }
 0x1e0   : > { %v422_v25 = vpop.f32.mrf.mxu1  ;;  %v476_v26 = vpop.f32.mrf.mxu0 }
 0x1e1   : > { %v480_v41 = vadd.f32 %v474_v23, %v421_v35 }
 0x1e2   : > { %v423_v28 = vpop.f32.mrf.mxu1  ;;  %v477_v29 = vpop.f32.mrf.mxu0 }
 0x1e4   : > { %v544_v31 = vpop.f32.mrf.mxu1  ;;  %v600_v32 = vpop.f32.mrf.mxu0 }
 0x1e5   : > { %v551_v42 = vadd.f32 %v544_v31, %v479_v38 }
 0x1e6   : > { %v546_v36 = vpop.f32.mrf.mxu1  ;;  %v602_v37 = vpop.f32.mrf.mxu0 }
 0x1e7   : > { %v552_v45 = vadd.f32 %v546_v36, %v480_v41  ;;  %v607_v48 = vadd.f32 %v600_v32, %v551_v42 }
 0x1e8   : > { %v548_v39 = vpop.f32.mrf.mxu1  ;;  %v604_v40 = vpop.f32.mrf.mxu0 }
 0x1e9   : > { %v608_v51 = vadd.f32 %v602_v37, %v552_v45 }
 0x1ea   : > { %v549_v43 = vpop.f32.mrf.mxu1  ;;  %v605_v44 = vpop.f32.mrf.mxu0 }
 0x1ec   : > { %v656_v46 = vpop.f32.mrf.mxu1  ;;  %v728_v47 = vpop.f32.mrf.mxu0 }
 0x1ed   : > { %v663_v54 = vadd.f32 %v656_v46, %v607_v48 }
 0x1ee   : > { %v658_v49 = vpop.f32.mrf.mxu1  ;;  %v730_v50 = vpop.f32.mrf.mxu0 }
 0x1ef   : > { %v664_v57 = vadd.f32 %v658_v49, %v608_v51  ;;  %v735_v62 = vadd.f32 %v728_v47, %v663_v54 }
 0x1f0   : > { %v660_v55 = vpop.f32.mrf.mxu1  ;;  %v732_v56 = vpop.f32.mrf.mxu0 }
 0x1f1   : > { %v736_v4 = vadd.f32 %v730_v50, %v664_v57 }
 0x1f2   : > { %v661_v58 = vpop.f32.mrf.mxu1  ;;  %v733_v61 = vpop.f32.mrf.mxu0 }
 0x1f4   : > { %v784_v63 = vpop.f32.mrf.mxu1  ;;  %v840_v3 = vpop.f32.mrf.mxu0 }
 0x1f5   : > { %v791_v5 = vadd.f32 %v784_v63, %v735_v62 }
 0x1f6   : > { %v786_v6 = vpop.f32.mrf.mxu1  ;;  %v842_v7 = vpop.f32.mrf.mxu0 }
 0x1f7   : > { %v847_v8 = vadd.f32 %v840_v3, %v791_v5  ;;  %v792_v9 = vadd.f32 %v786_v6, %v736_v4 }
 0x1f8   : > { %v788_v34 = vpop.f32.mrf.mxu1  ;;  %v844_v10 = vpop.f32.mrf.mxu0 }
 0x1f9   : > { %v848_v11 = vadd.f32 %v842_v7, %v792_v9  ;;  %v855_v2 = vmul.f32 %v847_v8, %v847_v8  ;;  %v850_v13 = vsel %vm849_vm0, %v847_v8, 0.0 }
 0x1fa   : > { %v789_v33 = vpop.f32.mrf.mxu1  ;;  %v845_v12 = vpop.f32.mrf.mxu0 }
 0x1fb   : > { %v851_v14 = vsel %vm849_vm0, %v848_v11, 0.0  ;;  %v856_v16 = vmul.f32 %v848_v11, %v848_v11  ;;  %v857_v19 = vsel %vm849_vm0, %v855_v2, 0.0 }
 0x1fc   : > { %v852_v17 = vadd.f32 %v851_v14, %v850_v13 }
 0x1fd   : > { %v858_v21 = vsel %vm849_vm0, %v856_v16, 0.0 }
 0x1fe   : > { %853 = vadd.xlane.f32.xlu0 %v852_v17  ;;  %v859_v22 = vadd.f32 %v858_v21, %v857_v19 }
 0x200   : > { %860 = vadd.xlane.f32.xlu1 %v859_v22 }
 0x287   : > { %v854_v23 = vpop.xlane.xlu0 %853 }
 0x288   : > { %v862_v25 = vmul.f32 0.00390625, %v854_v23 }
 0x289   : > { %v861_v26 = vpop.xlane.xlu1 %860 }
 0x28a   : > { %v863_v28 = vmul.f32 0.00390625, %v861_v26  ;;  %v864_v29 = vmul.f32 %v862_v25, %v862_v25  ;;  %v869_v35 = vsub.f32 %v847_v8, %v862_v25  ;;  %v870_v36 = vsub.f32 %v848_v11, %v862_v25 }
 0x28c   : > { %v865_v30 = vsub.f32 %v863_v28, %v864_v29 }
 0x28e   : > { %v866_v31 = vmax.f32 %v865_v30, 0.0 }
 0x290   : > { %v867_v32 = vadd.f32 1e-05, %v866_v31 }
 0x292   : > { %1732 = vrsqrt.f32 %v867_v32 }
 0x29f   : > { %v1733_v37 = vpop.eup %1732 }
 0x2a0   : > { %v871_v38 = vmul.f32 %v1733_v37, %v869_v35  ;;  %v872_v39 = vmul.f32 %v1733_v37, %v870_v36 }
 0x2a2   : > { %v2084_v40 = vmax.f32 %v871_v38, 0.0  ;;  %v2086_v41 = vmax.f32 %v872_v39, 0.0 }
 0x2a4   : > { %v1696_v42 = vpack.i.bf16 %v2086_v41, %v2084_v40  ;;  %v1143_v2 = vpack.c.bf16 %v2086_v41, %v2086_v41 }
 0x2a6   : > { %1697 = vrot.lane.b32.xlu1 %v1696_v42, %s1800_s7  ;;  %1692 = vrot.lane.b32.xlu0 %v1696_v42, %s1799_s6  ;;  %s188_s7 = sand.u32 1, %s1788_s16  }
 0x2a7   : > { %s1468_s5 = scalar_lea.sflag [#allocation3], %s188_s7 }
 0x318   : > { %v1698_v43 = vpop.permute.xlu1 %1697  ;;  %v1693_v44 = vpop.permute.xlu0 %1692 }
 0x319   : > { %v1700_v45 = vunpack.i.h.bf16 %v1698_v43  ;;  %v1699_v46 = vunpack.i.l.bf16 %v1698_v43  ;;  %v1695_v47 = vunpack.i.h.bf16 %v1693_v44  ;;  %v1694_v48 = vunpack.i.l.bf16 %v1693_v44 }
 0x31b   : > { %v885_v49 = vsel %vm217_vm3, %v1699_v46, %v1700_v45  ;;  %v886_v50 = vsel %vm217_vm3, %v1700_v45, %v1699_v46  ;;  %v879_v51 = vsel %vm210_vm2, %v1694_v48, %v1695_v47  ;;  %v880_v54 = vsel %vm210_vm2, %v1695_v47, %v1694_v48  ;;  %v909_v47 = vld [vmem:[%s2279_s3] sm:$0x3] }
 0x31c   : > { %v888_v55 = vsel %vm1908_vm4, %v880_v54, %v885_v49  ;;  %v887_v56 = vsel %vm237_vm7, %v879_v51, %v886_v50  ;;  %v2113_v20 = vsel %vm258_vm5, %v886_v50, %v879_v51  ;;  %v2117_v63 = vsel %vm1913_vm6, %v885_v49, %v880_v54  ;;  %v1579_v51 = vld [vmem:[%s2279_s3 + $0xc] sm:$0x3] }
 0x31d   : > { %v911_v57 = vpack.c.bf16 %v888_v55, %v888_v55  ;;  %v1706_v58 = vpack.i.bf16 %v888_v55, %v887_v56  ;;  %v910_v61 = vpack.c.bf16 %v887_v56, %v887_v56  ;;  %v1726_v3 = vpack.i.bf16 %v2117_v63, %v2113_v20 }
 0x31e   : > { %v1142_v49 = vpack.c.bf16 %v2084_v40, %v2084_v40 }
 0x31f   : > { %1575 = vmatprep.subr.msk.bf16.mxu1 %vm327_vm8, %v911_v57  ;;  %1707 = vrot.lane.b32.xlu1 %v1706_v58, %s1802_s13  ;;  %v918_v62 = vsel %vm327_vm8, %v910_v61, 0 }
 0x320   : > { %1702 = vrot.lane.b32.xlu0 %v1706_v58, %s1801_s8  ;;  %938 = vmatpush1.bf16.msra.mxu1 %v918_v62  ;;  %v1150_v15 = vsel %vm327_vm8, %v1142_v49, 0 }
 0x323   : > { %1717 = vrot.lane.b32.xlu1 %v1696_v42, %s1802_s13  ;;  %1576 = vmatmul.mubr.msk.bf16.vlgmr.msra.gmra.mxu1 %vm323_vm9, %v1574_v24 }
 0x324   : > { %1712 = vrot.lane.b32.xlu0 %v1696_v42, %s1801_s8  ;;  %1059 = vmatprep.mubr.bf16.mxu1 %v1798_v0 }
 0x327   : > { %1727 = vrot.lane.b32.xlu1 %v1726_v3, %s1802_s13  ;;  %s1606_s13 = sshll.u32 %s1850_s19, 7  ;;  %s1742_s19 = scalar_lea.vmem %s1741_s11, 256 }
 0x328   : > { %1722 = vrot.lane.b32.xlu0 %v1726_v3, %s1801_s8  ;;  %s1545_s8 = sshll.u32 %s188_s7, 3  ;;  %s1480_s30 = scalar_lea.hbm %s2280_s4, %s1606_s13 }
 0x329   : > { %s190_s23 = scalar_lea.vmem [#allocation2], %s1545_s8 }
 0x32a   : > { %s1482_s27 = sshll.u32 %s190_s23, 4  ;;  %s1483_s27 = int_to_ptr.vmem [resolvable:$true] %s1482_s27 }
 0x32b   : > { %s1736_s9 = scalar_lea.vmem %s1483_s27, 128  ;;  %p1743_p0 = scmp.lt.s32.totalorder %s1483_s27, %s1741_s11 }
 0x32c   : > { %p1737_p11 = scmp.ne.s32.totalorder %s1483_s27, %s1736_s9  ;;  %p1744_p1 = scmp.lt.s32.totalorder %s1742_s19, %s1736_s9 }
 0x32e   : > { %p1738_p12 = pnand %p1737_p11, %p1867_p5  ;;  %p1745_p2 = por %p1744_p1, %p1743_p0 }
 0x330   : > { %p1739_p13 = pneg %p1738_p12 }
 0x332   : > { %p1746_p3 = pnand %p1745_p2, %p1739_p13 }
 0x391   : > { %v1708_v18 = vpop.permute.xlu1 %1707 }
 0x392   : > { %v1710_v4 = vunpack.i.h.bf16 %v1708_v18  ;;  %v1709_v27 = vunpack.i.l.bf16 %v1708_v18  ;;  %v1703_v5 = vpop.permute.xlu0 %1702  ;;  %v1582_v18 = vld [vmem:[%s2279_s3 + $0x2] sm:$0x3] }
 0x393   : > { %v1705_v6 = vunpack.i.h.bf16 %v1703_v5  ;;  %v1704_v7 = vunpack.i.l.bf16 %v1703_v5 }
 0x394   : > { %v902_v8 = vsel %vm273_vm11, %v1710_v4, %v1709_v27  ;;  %v901_v9 = vsel %vm273_vm11, %v1709_v27, %v1710_v4  ;;  %v1585_v27 = vld [vmem:[%s2279_s3 + $0x8] sm:$0x3] }
 0x395   : > { %v895_v34 = vsel %vm266_vm10, %v1704_v7, %v1705_v6  ;;  %v896_v10 = vsel %vm266_vm10, %v1705_v6, %v1704_v7  ;;  %v1718_v11 = vpop.permute.xlu1 %1717  ;;  %v1327_v6 = vpack.c.bf16 %v2117_v63, %v2117_v63  ;;  %v1326_v63 = vpack.c.bf16 %v2113_v20, %v2113_v20  ;;  %v1594_v20 = vld [vmem:[%s2279_s3 + $0xa] sm:$0x3] }
 0x396   : > { %v1720_v33 = vunpack.i.h.bf16 %v1718_v11  ;;  %v1719_v12 = vunpack.i.l.bf16 %v1718_v11  ;;  %v1713_v13 = vpop.permute.xlu0 %1712  ;;  %v904_v14 = vsel %vm1958_vm12, %v902_v8, %v895_v34  ;;  %v906_v16 = vsel %vm1962_vm13, %v895_v34, %v902_v8 }
 0x397   : > { %v1715_v17 = vunpack.i.h.bf16 %v1713_v13  ;;  %v1714_v19 = vunpack.i.l.bf16 %v1713_v13  ;;  %v908_v21 = vpack.c.bf16 %v904_v14, %v904_v14  ;;  %v1015_v22 = vpack.c.bf16 %v906_v16, %v906_v16 }
 0x398   : > { %v1080_v23 = vsel %vm273_vm11, %v1719_v12, %v1720_v33  ;;  %v1081_v25 = vsel %vm273_vm11, %v1720_v33, %v1719_v12  ;;  %v903_v26 = vsel %vm292_vm14, %v901_v9, %v896_v10  ;;  %v905_v28 = vsel %vm312_vm15, %v896_v10, %v901_v9  ;;  %v1588_v9 = vld [vmem:[%s2279_s3 + $0xe] sm:$0x3]  ;;  %v1591_v10 = vld [vmem:[%s2279_s3 + $0x4] sm:$0x3] }
 0x399   : > { %v1074_v29 = vsel %vm266_vm10, %v1714_v19, %v1715_v17  ;;  %v1075_v30 = vsel %vm266_vm10, %v1715_v17, %v1714_v19  ;;  %1577 = vmatprep.subr.msk.bf16.mxu0 %vm327_vm8, %v908_v21  ;;  %1580 = vmatprep.subr.msk.bf16.mxu1 %vm327_vm8, %v1015_v22  ;;  %v1728_v31 = vpop.permute.xlu1 %1727  ;;  %v907_v32 = vpack.c.bf16 %v903_v26, %v903_v26  ;;  %v1334_v53 = vsel %vm327_vm8, %v1326_v63, 0 }
 0x39a   : > { %v1730_v35 = vunpack.i.h.bf16 %v1728_v31  ;;  %v1729_v36 = vunpack.i.l.bf16 %v1728_v31  ;;  %v1723_v37 = vpop.permute.xlu0 %1722  ;;  %v1014_v38 = vpack.c.bf16 %v905_v28, %v905_v28  ;;  %v1083_v39 = vsel %vm1958_vm12, %v1081_v25, %v1074_v29 }
 0x39b   : > { %v1725_v41 = vunpack.i.h.bf16 %v1723_v37  ;;  %v1724_v42 = vunpack.i.l.bf16 %v1723_v37  ;;  %v968_v43 = vsel %vm327_vm8, %v907_v32, 0  ;;  %v1087_v44 = vpack.c.bf16 %v1083_v39, %v1083_v39 }
 0x39c   : > { %v1265_v45 = vsel %vm273_vm11, %v1730_v35, %v1729_v36  ;;  %988 = vmatpush1.bf16.msra.mxu0 %v968_v43  ;;  %v1022_v46 = vsel %vm327_vm8, %v1014_v38, 0  ;;  %v1082_v48 = vsel %vm292_vm14, %v1080_v23, %v1075_v30  ;;  %v1264_v55 = vsel %vm273_vm11, %v1729_v36, %v1730_v35 }
 0x39d   : > { %v1258_v50 = vsel %vm266_vm10, %v1724_v42, %v1725_v41  ;;  %1042 = vmatpush1.bf16.msra.mxu1 %v1022_v46  ;;  %1583 = vmatprep.subr.msk.bf16.mxu0 %vm327_vm8, %v1087_v44  ;;  %v1086_v54 = vpack.c.bf16 %v1082_v48, %v1082_v48  ;;  %v1259_v56 = vsel %vm266_vm10, %v1725_v41, %v1724_v42 }
 0x39e   : > { %1586 = vmatprep.subr.msk.bf16.mxu1 %vm327_vm8, %v1143_v2  ;;  %v1085_v40 = vsel %vm1962_vm13, %v1074_v29, %v1081_v25  ;;  %v1267_v57 = vsel %vm1958_vm12, %v1265_v45, %v1258_v50  ;;  %v1084_v24 = vsel %vm312_vm15, %v1075_v30, %v1080_v23  ;;  %v1266_v59 = vsel %vm292_vm14, %v1264_v55, %v1259_v56  ;;  %v1597_v2 = vld [vmem:[%s2279_s3 + $0x10] sm:$0x3] }
 0x39f   : > { %1578 = vmatmul.mubr.msk.bf16.vlgmr.msra.gmra.mxu0 %vm323_vm9, %v909_v47  ;;  %v1094_v58 = vsel %vm327_vm8, %v1086_v54, 0  ;;  %v1199_v61 = vpack.c.bf16 %v1085_v40, %v1085_v40  ;;  %v1271_v62 = vpack.c.bf16 %v1267_v57, %v1267_v57  ;;  %v1198_v3 = vpack.c.bf16 %v1084_v24, %v1084_v24 }
 0x3a0   : > { %1581 = vmatmul.mubr.msk.bf16.vlgmr.msra.gmra.mxu1 %vm323_vm9, %v1579_v51  ;;  %1114 = vmatpush1.bf16.msra.mxu0 %v1094_v58  ;;  %v1270_v4 = vpack.c.bf16 %v1266_v59, %v1266_v59  ;;  %v1269_v52 = vsel %vm1962_vm13, %v1258_v50, %v1265_v45  ;;  %v1268_v60 = vsel %vm312_vm15, %v1259_v56, %v1264_v55 }
 0x3a1   : > { %1170 = vmatpush1.bf16.msra.mxu1 %v1150_v15  ;;  %1589 = vmatprep.subr.msk.bf16.mxu0 %vm327_vm8, %v1199_v61  ;;  %v1206_v5 = vsel %vm327_vm8, %v1198_v3, 0  ;;  %v1383_v8 = vpack.c.bf16 %v1269_v52, %v1269_v52  ;;  %v1382_v34 = vpack.c.bf16 %v1268_v60, %v1268_v60 }
 0x3a2   : > { %1592 = vmatprep.subr.msk.bf16.mxu1 %vm327_vm8, %v1271_v62  ;;  %1131 = vmatprep.mubr.bf16.mxu0 %v1798_v0  ;;  %v1278_v7 = vsel %vm327_vm8, %v1270_v4, 0 }
 0x3a3   : > { %1187 = vmatprep.mubr.bf16.mxu1 %v1798_v0  ;;  %v1390_v11 = vsel %vm327_vm8, %v1382_v34, 0 }
 0x3a7   : > { %1584 = vmatmul.mubr.msk.bf16.vlgmr.msra.gmra.mxu0 %vm323_vm9, %v1582_v18 }
 0x3a8   : > { %1587 = vmatmul.mubr.msk.bf16.vlgmr.msra.gmra.mxu1 %vm323_vm9, %v1585_v27  ;;  %1226 = vmatpush1.bf16.msra.mxu0 %v1206_v5 }
 0x3a9   : > { %1298 = vmatpush1.bf16.msra.mxu1 %v1278_v7  ;;  %1595 = vmatprep.subr.msk.bf16.mxu0 %vm327_vm8, %v1327_v6 }
 0x3aa   : > { %1598 = vmatprep.subr.msk.bf16.mxu1 %vm327_vm8, %v1383_v8  ;;  %1243 = vmatprep.mubr.bf16.mxu0 %v1798_v0 }
 0x3ab   : > { %1315 = vmatprep.mubr.bf16.mxu1 %v1798_v0 }
 0x3af   : > { %1590 = vmatmul.mubr.msk.bf16.vlgmr.msra.gmra.mxu0 %vm323_vm9, %v1588_v9 }
 0x3b0   : > { %1593 = vmatmul.mubr.msk.bf16.vlgmr.msra.gmra.mxu1 %vm323_vm9, %v1591_v10  ;;  %1354 = vmatpush1.bf16.msra.mxu0 %v1334_v53 }
 0x3b1   : > { %1410 = vmatpush1.bf16.msra.mxu1 %v1390_v11  ;;  %1371 = vmatprep.mubr.bf16.mxu0 %v1798_v0 }
 0x3b2   : > { %1427 = vmatprep.mubr.bf16.mxu1 %v1798_v0 }
 0x3b7   : > { %1596 = vmatmul.mubr.msk.bf16.vlgmr.msra.gmra.mxu0 %vm323_vm9, %v1594_v20 }
 0x3b8   : > { %1599 = vmatmul.mubr.msk.bf16.vlgmr.msra.gmra.mxu1 %vm323_vm9, %v1597_v2 }
 0x3e3   : > { %v957_v33 = vpop.f32.mrf.mxu1 }
 0x3e5   : > { %v959_v12 = vpop.f32.mrf.mxu1 }
 0x3e7   : > { %v961_v13 = vpop.f32.mrf.mxu1 }
 0x3e9   : > { %v962_v14 = vpop.f32.mrf.mxu1 }
 0x45f   : > { %v1007_v16 = vpop.f32.mrf.mxu0 }
 0x460   : > { %v1061_v17 = vpop.f32.mrf.mxu1  ;;  %v1008_v25 = vadd.f32 %v1007_v16, %v957_v33 }
 0x461   : > { %v1009_v19 = vpop.f32.mrf.mxu0 }
 0x462   : > { %v1063_v0 = vpop.f32.mrf.mxu1  ;;  %v1010_v29 = vadd.f32 %v1009_v19, %v959_v12  ;;  %v1068_v32 = vadd.f32 %v1061_v17, %v1008_v25 }
 0x463   : > { %v1011_v21 = vpop.f32.mrf.mxu0 }
 0x464   : > { %v1065_v22 = vpop.f32.mrf.mxu1  ;;  %v1069_v37 = vadd.f32 %v1063_v0, %v1010_v29 }
 0x465   : > { %v1012_v23 = vpop.f32.mrf.mxu0 }
 0x466   : > { %v1066_v26 = vpop.f32.mrf.mxu1 }
 0x467   : > { %v1133_v28 = vpop.f32.mrf.mxu0 }
 0x468   : > { %v1189_v30 = vpop.f32.mrf.mxu1  ;;  %v1140_v38 = vadd.f32 %v1133_v28, %v1068_v32 }
 0x469   : > { %v1135_v31 = vpop.f32.mrf.mxu0 }
 0x46a   : > { %v1191_v35 = vpop.f32.mrf.mxu1  ;;  %v1141_v42 = vadd.f32 %v1135_v31, %v1069_v37  ;;  %v1196_v45 = vadd.f32 %v1189_v30, %v1140_v38 }
 0x46b   : > { %v1137_v36 = vpop.f32.mrf.mxu0 }
 0x46c   : > { %v1193_v39 = vpop.f32.mrf.mxu1  ;;  %v1197_v48 = vadd.f32 %v1191_v35, %v1141_v42 }
 0x46d   : > { %v1138_v41 = vpop.f32.mrf.mxu0 }
 0x46e   : > { %v1194_v43 = vpop.f32.mrf.mxu1 }
 0x46f   : > { %v1245_v44 = vpop.f32.mrf.mxu0 }
 0x470   : > { %v1317_v46 = vpop.f32.mrf.mxu1  ;;  %v1252_v49 = vadd.f32 %v1245_v44, %v1196_v45 }
 0x471   : > { %v1247_v47 = vpop.f32.mrf.mxu0 }
 0x472   : > { %v1319_v50 = vpop.f32.mrf.mxu1  ;;  %v1253_v54 = vadd.f32 %v1247_v47, %v1197_v48  ;;  %v1324_v40 = vadd.f32 %v1317_v46, %v1252_v49 }
 0x473   : > { %v1249_v51 = vpop.f32.mrf.mxu0 }
 0x474   : > { %v1321_v55 = vpop.f32.mrf.mxu1  ;;  %v1325_v61 = vadd.f32 %v1319_v50, %v1253_v54 }
 0x475   : > { %v1250_v56 = vpop.f32.mrf.mxu0 }
 0x476   : > { %v1322_v57 = vpop.f32.mrf.mxu1 }
 0x477   : > { %v1373_v58 = vpop.f32.mrf.mxu0 }
 0x478   : > { %v1380_v62 = vadd.f32 %v1373_v58, %v1324_v40  ;;  %v1429_v15 = vpop.f32.mrf.mxu1 }
 0x479   : > { %v1375_v24 = vpop.f32.mrf.mxu0 }
 0x47a   : > { %v1436_v59 = vadd.f32 %v1429_v15, %v1380_v62  ;;  %v1381_v3 = vadd.f32 %v1375_v24, %v1325_v61  ;;  %v1431_v18 = vpop.f32.mrf.mxu1 }
 0x47b   : > { %v1377_v4 = vpop.f32.mrf.mxu0 }
 0x47c   : > { %v1437_v27 = vadd.f32 %v1431_v18, %v1381_v3  ;;  %v1433_v52 = vpop.f32.mrf.mxu1  ;;  %v1443_v5 = vmul.f32 %v1436_v59, %v1436_v59  ;;  %v1438_v8 = vsel %vm849_vm0, %v1436_v59, 0.0 }
 0x47d   : > { %v1378_v6 = vpop.f32.mrf.mxu0 }
 0x47e   : > { %v1434_v7 = vpop.f32.mrf.mxu1  ;;  %v1439_v60 = vsel %vm849_vm0, %v1437_v27, 0.0  ;;  %v1444_v63 = vmul.f32 %v1437_v27, %v1437_v27  ;;  %v1445_v34 = vsel %vm849_vm0, %v1443_v5, 0.0 }
 0x47f   : > { %v1440_v9 = vadd.f32 %v1439_v60, %v1438_v8 }
 0x480   : > { %v1446_v10 = vsel %vm849_vm0, %v1444_v63, 0.0 }
 0x481   : > { %1441 = vadd.xlane.f32.xlu0 %v1440_v9  ;;  %v1447_v53 = vadd.f32 %v1446_v10, %v1445_v34 }
 0x483   : > { %1448 = vadd.xlane.f32.xlu1 %v1447_v53 }
 0x50a   : > { %v1442_v11 = vpop.xlane.xlu0 %1441 }
 0x50b   : > { %v1450_v20 = vmul.f32 0.00390625, %v1442_v11 }
 0x50c   : > { %v1449_v2 = vpop.xlane.xlu1 %1448 }
 0x50d   : > { %v1451_v33 = vmul.f32 0.00390625, %v1449_v2  ;;  %v1452_v12 = vmul.f32 %v1450_v20, %v1450_v20  ;;  %v1457_v17 = vsub.f32 %v1436_v59, %v1450_v20  ;;  %v1458_v19 = vsub.f32 %v1437_v27, %v1450_v20 }
 0x50f   : > { %v1453_v13 = vsub.f32 %v1451_v33, %v1452_v12 }
 0x511   : > { %v1454_v14 = vmax.f32 %v1453_v13, 0.0 }
 0x513   : > { %v1455_v16 = vadd.f32 1e-05, %v1454_v14 }
 0x515   : > { %1734 = vrsqrt.f32 %v1455_v16 }
 0x522   : > { %v1735_v0 = vpop.eup %1734 }
 0x523   : > { %v1459_v21 = vmul.f32 %v1735_v0, %v1457_v17  ;;  %v1460_v22 = vmul.f32 %v1735_v0, %v1458_v19 }
 0x525   : > { %v1463_v23 = vcombine.low %v1459_v21, %v1460_v22 }
 0x527   : > { %v1465_v25 = vadd.f32 %v1463_v23, %v1884_v1 }
 0x529   : > { %1466 = vst [vmem:[%s190_s23] sm:$0xff] %v1465_v25 }
 0x52a   : > { %1749 = shalt.err (!%p1746_p3)
}
 0x52b   : > { %s1750_s12 = scalar_lea.hbm %s1480_s30, 128  ;;  %s1754_s22 = scalar_lea.hbm %s2280_s4, 256 }
 0x52c   : > { %p1751_p4 = scmp.ne.s32.totalorder %s1480_s30, %s1750_s12  ;;  %p1755_p9 = scmp.lt.s32.totalorder %s1480_s30, %s2280_s4 }
 0x52d   : > { %p1756_p10 = scmp.lt.s32.totalorder %s1754_s22, %s1750_s12 }
 0x52e   : > { %p1752_p7 = pnand %p1751_p4, %p1867_p5 }
 0x52f   : > { %p1757_p11 = por %p1756_p10, %p1755_p9 }
 0x530   : > { %p1753_p8 = pneg %p1752_p7 }
 0x532   : > { %p1758_p12 = pnand %p1757_p11, %p1753_p8 }
 0x534   : > { %1761 = shalt.err (!%p1758_p12)
}
 0x535   : > { %1607 = dma.vmem_to_hbm [thread:$0]  (%p1867_p5), %s1483_s27, 128, %s1480_s30, %s1468_s5  }
 0x536 PF: > { %p1613_p13 = scmp.ge.s32.totalorder %s1796_s18, 2  ;;  %s1494_s8 = sand.u32 1, %s1784_s15  }
 0x537   : > { %s1495_s13 = scalar_lea.sflag [#allocation3], %s1494_s8 }
 0x538   : > { %p1610_p0 = pnand %p1613_p13, %p1871_p6 }
 0x53a   : > { %p1611_p1 = pneg %p1610_p0 }
 0x53c   : > { %1779 = dma.done.wait (%p1611_p1), %s1495_s13, 128  }
 0x53d   : > { %1781 = vsyncadd (%p1611_p1), %s1495_s13, 4294967168  ;;  %p14_p2 = scmp.ge.s32.totalorder %s1854_s21, 4   ;;  %s2291_s15 = smov %s1788_s16 }
 0x53e   : > { %s2292_s16 = smov %s1792_s17  ;;  %s2293_s17 = smov %s1865_s24 }
 0x53f   : > { %s2294_s18 = smov %s1854_s21  ;;  %16 = sbr.rel (!%p14_p2) target bundleno = 3 (0x3), region = 87 }
 0x544   :  { %1500 = vsyncpa [#allocation3], 1 }
 0x545   :  { %1502 = vsyncpa [#allocation3 + $0x1], 1 }

</bundles_post_ra>
